<compile_context>
chip_gen: v5e
topology: v5e:2x2
jax: 0.10.0
libtpu: 0.0.40
codegen_flags: <defaults>
</compile_context>

<pallas_src>
import functools

import numpy as np

import jax
import jax.numpy as jnp
from jax.experimental import pallas as pl
from jax.experimental.pallas import tpu as pltpu


# --------------------------------------------------------------------------
# Trace-time constant builders (numpy, no device scatters)
# --------------------------------------------------------------------------
def _interp_matrix_np(n_in, scale=2):
    """Bilinear interpolation matrix (align_corners=True): out = A @ in."""
    n_out = n_in * scale
    if n_in == 1:
        return np.ones((n_out, 1), np.float32)
    src = np.arange(n_out, dtype=np.float64) * (n_in - 1) / (n_out - 1)
    lo = np.clip(np.floor(src).astype(np.int64), 0, n_in - 2)
    frac = (src - lo).astype(np.float64)
    A = np.zeros((n_out, n_in), np.float64)
    idx = np.arange(n_out)
    A[idx, lo] += 1.0 - frac
    A[idx, lo + 1] += frac
    return A.astype(np.float32)


def _row_shift_selectors_np(W):
    """S[dx, u, w] = 1 iff packed input column block u feeds output column w
    for horizontal tap dx (zero padding columns simply drop out)."""
    return np.stack([np.eye(W, W, k=1 - dx) for dx in range(3)]).astype(np.float32)


# --------------------------------------------------------------------------
# Wrapper-side weight lowering (runs once under jit, tiny)
# --------------------------------------------------------------------------
def _build_row_weights(wt, W):
    """wt: (Cout, Cin, 3, 3) PyTorch layout  ->  (3, W*C, W*C) row-lowered.

    out_packed[h] = sum_dy xp_packed[h+dy] @ Wrow[dy]
    with packed column index  u*C + cin  (input) /  w*C + cout  (output).
    """
    C = wt.shape[0]
    S = jnp.asarray(_row_shift_selectors_np(W))              # (3, W, W)
    wrow = jnp.einsum('xuw,oiyx->yuiwo', S, wt)               # (3, W, C, W, C)
    return wrow.reshape(3, W * C, W * C)


def _pack_bias(b, W):
    """b: (C,) -> (1, W*C) broadcastable packed bias."""
    return jnp.tile(b, W).reshape(1, W * b.shape[0])


# --------------------------------------------------------------------------
# Fused FeatureFusionBlock1 forward (NCHW in / NCHW out, like PyTorch)
# --------------------------------------------------------------------------
@functools.partial(jax.jit, static_argnames=())
def feature_fusion_block1(params, *xs):
    x0 = xs[0].astype(jnp.float32)
    N, C, H, W = x0.shape
    WC = W * C
    two_inputs = len(xs) == 2

    # NCHW -> packed (N, H, W*C)   (single boundary transpose, lane-dense after)
    x0p = jnp.transpose(x0, (0, 2, 3, 1)).reshape(N, H, WC)
    if two_inputs:
        x1p = jnp.transpose(xs[1].astype(jnp.float32), (0, 2, 3, 1)).reshape(N, H, WC)

    # Row-lowered conv weights / packed biases for the convs actually used.
    if two_inputs:
        convs = [('rcu1', 'w1', 'b1'), ('rcu1', 'w2', 'b2'),
                 ('rcu2', 'w1', 'b1'), ('rcu2', 'w2', 'b2')]
    else:
        convs = [('rcu2', 'w1', 'b1'), ('rcu2', 'w2', 'b2')]
    Wall = jnp.stack([_build_row_weights(params[r][w], W) for r, w, _ in convs])  # (n,3,WC,WC)
    Ball = jnp.stack([_pack_bias(params[r][b], W) for r, _, b in convs])          # (n,1,WC)
    n_conv = len(convs)

    # Upsample matrices (numpy constants at trace time).
    Ah = jnp.asarray(_interp_matrix_np(H))                                        # (2H, H)
    AwT = jnp.asarray(
        np.kron(_interp_matrix_np(W), np.eye(C, dtype=np.float32)).T
        .astype(np.float32))                                                      # (WC, 2WC)

    # ---------------- fused kernel (one batch element per grid step) ----------------
    def _make_conv(w_ref, b_ref, xp_ref):
        def conv(idx):
            acc = jnp.zeros((H, WC), jnp.float32) + b_ref[idx]
            for dy in range(3):
                acc = acc + jnp.dot(xp_ref[dy:dy + H, :], w_ref[idx, dy, :, :],
                                    preferred_element_type=jnp.float32)
            return acc
        return conv

    def _upsample_and_store(out, ah_ref, awt_ref, o_ref):
        y = jnp.dot(ah_ref[...], out, preferred_element_type=jnp.float32)   # (2H, WC)
        o_ref[0] = jnp.dot(y, awt_ref[...], preferred_element_type=jnp.float32)  # (2H, 2WC)

    def kernel2(x0_ref, x1_ref, w_ref, b_ref, ah_ref, awt_ref, o_ref, xp_ref):
        conv = _make_conv(w_ref, b_ref, xp_ref)
        xp_ref[...] = jnp.zeros_like(xp_ref)            # zero halo rows once
        # --- resConfUnit1(x1) ---
        x1 = x1_ref[0]
        xp_ref[1:H + 1, :] = jnp.maximum(x1, 0.0)
        h = conv(0)
        xp_ref[1:H + 1, :] = jnp.maximum(h, 0.0)
        out = x0_ref[0] + conv(1) + x1                  # output = x0 + RCU1(x1)
        # --- resConfUnit2(output) ---
        xp_ref[1:H + 1, :] = jnp.maximum(out, 0.0)
        h = conv(2)
        xp_ref[1:H + 1, :] = jnp.maximum(h, 0.0)
        out = conv(3) + out
        # --- 2x bilinear upsample (align_corners=True) ---
        _upsample_and_store(out, ah_ref, awt_ref, o_ref)

    def kernel1(x0_ref, w_ref, b_ref, ah_ref, awt_ref, o_ref, xp_ref):
        conv = _make_conv(w_ref, b_ref, xp_ref)
        xp_ref[...] = jnp.zeros_like(xp_ref)
        x0 = x0_ref[0]
        xp_ref[1:H + 1, :] = jnp.maximum(x0, 0.0)
        h = conv(0)
        xp_ref[1:H + 1, :] = jnp.maximum(h, 0.0)
        out = conv(1) + x0
        _upsample_and_store(out, ah_ref, awt_ref, o_ref)

    x_specs = [pl.BlockSpec((1, H, WC), lambda n: (n, 0, 0))
               for _ in range(2 if two_inputs else 1)]
    in_specs = x_specs + [
        pl.BlockSpec((n_conv, 3, WC, WC), lambda n: (0, 0, 0, 0)),
        pl.BlockSpec((n_conv, 1, WC), lambda n: (0, 0, 0)),
        pl.BlockSpec((2 * H, H), lambda n: (0, 0)),
        pl.BlockSpec((WC, 2 * WC), lambda n: (0, 0)),
    ]
    out_spec = pl.BlockSpec((1, 2 * H, 2 * WC), lambda n: (n, 0, 0))

    args = ([x0p, x1p] if two_inputs else [x0p]) + [Wall, Ball, Ah, AwT]
    out2d = pl.pallas_call(
        kernel2 if two_inputs else kernel1,
        out_shape=jax.ShapeDtypeStruct((N, 2 * H, 2 * WC), jnp.float32),
        grid_spec=pltpu.PrefetchScalarGridSpec(
            num_scalar_prefetch=0, grid=(N,),
            in_specs=in_specs, out_specs=out_spec,
            scratch_shapes=[pltpu.VMEM((H + 2, WC), jnp.float32)]),
        compiler_params=pltpu.CompilerParams(dimension_semantics=("parallel",)),
    )(*args)

    # packed (N, 2H, 2W*C) -> NCHW
    out = out2d.reshape(N, 2 * H, 2 * W, C)
    return jnp.transpose(out, (0, 3, 1, 2))


# --------------------------------------------------------------------------
# Parameters (PyTorch nn.Conv2d layout: weight (Cout, Cin, 3, 3), bias (C,))
# --------------------------------------------------------------------------
def init_params(key, features):
    ks = jax.random.split(key, 8)
    s = 0.1

    def cw(k):
        return s * jax.random.normal(k, (features, features, 3, 3), jnp.float32)

    def cb(k):
        return s * jax.random.normal(k, (features,), jnp.float32)

    return {
        'rcu1': {'w1': cw(ks[0]), 'b1': cb(ks[1]), 'w2': cw(ks[2]), 'b2': cb(ks[3])},
        'rcu2': {'w1': cw(ks[4]), 'b1': cb(ks[5]), 'w2': cw(ks[6]), 'b2': cb(ks[7])},
    }


# --------------------------------------------------------------------------
# Pure-JAX reference (lax.conv + interpolation matrices) for correctness check
# --------------------------------------------------------------------------
def _ref_conv3x3(x_nhwc, wt, b):
    w_hwio = jnp.transpose(wt, (2, 3, 1, 0))          # (3,3,Cin,Cout)
    y = jax.lax.conv_general_dilated(
        x_nhwc, w_hwio, window_strides=(1, 1), padding='SAME',
        dimension_numbers=('NHWC', 'HWIO', 'NHWC'))
    return y + b


def _ref_rcu(x, p):
    h = _ref_conv3x3(jnp.maximum(x, 0.0), p['w1'], p['b1'])
    return _ref_conv3x3(jnp.maximum(h, 0.0), p['w2'], p['b2']) + x


def _ref_block(params, *xs):
    x0 = jnp.transpose(xs[0].astype(jnp.float32), (0, 2, 3, 1))
    out = x0
    if len(xs) == 2:
        x1 = jnp.transpose(xs[1].astype(jnp.float32), (0, 2, 3, 1))
        out = out + _ref_rcu(x1, params['rcu1'])
    out = _ref_rcu(out, params['rcu2'])
    H, W = out.shape[1], out.shape[2]
    Ah = jnp.asarray(_interp_matrix_np(H))
    Aw = jnp.asarray(_interp_matrix_np(W))
    out = jnp.einsum('ih,nhwc->niwc', Ah, out)
    out = jnp.einsum('jw,niwc->nijc', Aw, out)
    return jnp.transpose(out, (0, 3, 1, 2))


# --------------------------------------------------------------------------
if __name__ == "__main__":
    key = jax.random.PRNGKey(0)
    k_p, k_x0, k_x1 = jax.random.split(key, 3)

    features = 4
    N, H, W = 2, 16, 16
    params = init_params(k_p, features)

    x0 = jax.random.normal(k_x0, (N, features, H, W), jnp.float32)  # NCHW
    x1 = jax.random.normal(k_x1, (N, features, H, W), jnp.float32)  # NCHW

    # two-input path (output = x0 + RCU1(x1), then RCU2, then 2x upsample)
    out2 = jax.block_until_ready(feature_fusion_block1(params, x0, x1))
    assert out2.shape == (N, features, 2 * H, 2 * W), out2.shape
    assert out2.dtype == jnp.float32
    assert bool(jnp.all(jnp.isfinite(out2)))
    ref2 = _ref_block(params, x0, x1)
    err2 = float(jnp.max(jnp.abs(out2 - ref2)))
    assert err2 < 1e-3, f"two-input mismatch: {err2}"

    # one-input path (RCU2 + upsample only)
    out1 = jax.block_until_ready(feature_fusion_block1(params, x0))
    assert out1.shape == (N, features, 2 * H, 2 * W), out1.shape
    ref1 = _ref_block(params, x0)
    err1 = float(jnp.max(jnp.abs(out1 - ref1)))
    assert err1 < 1e-3, f"one-input mismatch: {err1}"

    print("KERNEL_OK")
</pallas_src>

<mosaic_0001>
module attributes {stable_mosaic.version = 11 : i64} {
  func.func @kernel2(%arg0: i32, %arg1: memref<1x16x64xf32, #tpu.memory_space<vmem>>, %arg2: memref<1x16x64xf32, #tpu.memory_space<vmem>>, %arg3: memref<4x3x64x64xf32, #tpu.memory_space<vmem>>, %arg4: memref<4x1x64xf32, #tpu.memory_space<vmem>>, %arg5: memref<32x16xf32, #tpu.memory_space<vmem>>, %arg6: memref<64x128xf32, #tpu.memory_space<vmem>>, %arg7: memref<1x32x128xf32, #tpu.memory_space<vmem>>, %arg8: memref<18x64xf32, #tpu.memory_space<vmem>>) attributes {dimension_semantics = [#tpu.dimension_semantics<parallel>], iteration_bounds = array<i64: 2>, scalar_prefetch = 0 : i64, scratch_operands = 1 : i64, tpu.core_type = #tpu.core_type<tc>, window_params = [{transform_indices = @transform_0, window_bounds = array<i64: 1, 16, 64>}, {transform_indices = @transform_1, window_bounds = array<i64: 1, 16, 64>}, {pipeline_mode = #tpu.pipeline_mode<synchronous>, transform_indices = @transform_2, window_bounds = array<i64: 4, 3, 64, 64>}, {pipeline_mode = #tpu.pipeline_mode<synchronous>, transform_indices = @transform_3, window_bounds = array<i64: 4, 1, 64>}, {pipeline_mode = #tpu.pipeline_mode<synchronous>, transform_indices = @transform_4, window_bounds = array<i64: 32, 16>}, {pipeline_mode = #tpu.pipeline_mode<synchronous>, transform_indices = @transform_5, window_bounds = array<i64: 64, 128>}, {transform_indices = @transform_6, window_bounds = array<i64: 1, 32, 128>}]} {
    %cst = arith.constant 0.000000e+00 : f32
    %0 = vector.broadcast %cst : f32 to vector<18x64xf32>
    %c0 = arith.constant 0 : index
    %c0_0 = arith.constant 0 : index
    %1 = vector.load %arg8[%c0, %c0_0] : memref<18x64xf32, #tpu.memory_space<vmem>>, vector<18x64xf32>
    tpu.vector_store %arg8[%c0, %c0_0], %0 {strides = array<i32>} : memref<18x64xf32, #tpu.memory_space<vmem>>, vector<18x64xf32>,
    %c0_1 = arith.constant 0 : index
    %c0_2 = arith.constant 0 : index
    %c0_3 = arith.constant 0 : index
    %2 = vector.load %arg2[%c0_1, %c0_2, %c0_3] : memref<1x16x64xf32, #tpu.memory_space<vmem>>, vector<1x16x64xf32>
    %3 = vector.shape_cast %2 : vector<1x16x64xf32> to vector<16x64xf32>
    %cst_4 = arith.constant 0.000000e+00 : f32
    %4 = vector.broadcast %cst_4 : f32 to vector<16x64xf32>
    %5 = arith.maximumf %3, %4 : vector<16x64xf32>
    %c1 = arith.constant 1 : index
    %c0_5 = arith.constant 0 : index
    %6 = vector.load %arg8[%c1, %c0_5] : memref<18x64xf32, #tpu.memory_space<vmem>>, vector<16x64xf32>
    tpu.vector_store %arg8[%c1, %c0_5], %5 {strides = array<i32>} : memref<18x64xf32, #tpu.memory_space<vmem>>, vector<16x64xf32>,
    %cst_6 = arith.constant 0.000000e+00 : f32
    %7 = vector.broadcast %cst_6 : f32 to vector<16x64xf32>
    %c0_7 = arith.constant 0 : index
    %c0_8 = arith.constant 0 : index
    %c0_9 = arith.constant 0 : index
    %8 = vector.load %arg4[%c0_7, %c0_8, %c0_9] : memref<4x1x64xf32, #tpu.memory_space<vmem>>, vector<1x1x64xf32>
    %9 = vector.shape_cast %8 : vector<1x1x64xf32> to vector<1x64xf32>
    %10 = vector.broadcast %9 : vector<1x64xf32> to vector<16x64xf32>
    %11 = arith.addf %7, %10 : vector<16x64xf32>
    %c0_10 = arith.constant 0 : index
    %c0_11 = arith.constant 0 : index
    %12 = vector.load %arg8[%c0_10, %c0_11] : memref<18x64xf32, #tpu.memory_space<vmem>>, vector<16x64xf32>
    %c0_12 = arith.constant 0 : index
    %c0_13 = arith.constant 0 : index
    %c0_14 = arith.constant 0 : index
    %c0_15 = arith.constant 0 : index
    %13 = vector.load %arg3[%c0_12, %c0_13, %c0_14, %c0_15] : memref<4x3x64x64xf32, #tpu.memory_space<vmem>>, vector<1x1x64x64xf32>
    %14 = vector.shape_cast %13 : vector<1x1x64x64xf32> to vector<64x64xf32>
    %cst_16 = arith.constant dense<0.000000e+00> : vector<16x64xf32>
    %15 = tpu.matmul %12, %14, %cst_16 {dimension_numbers = #tpu.dot_dimension_numbers<[1], [0], [0], [1], [0, 0, 1, 1], [], []>} : vector<16x64xf32>, vector<64x64xf32>, vector<16x64xf32> -> vector<16x64xf32>
    %16 = arith.addf %11, %15 : vector<16x64xf32>
    %c1_17 = arith.constant 1 : index
    %c0_18 = arith.constant 0 : index
    %17 = vector.load %arg8[%c1_17, %c0_18] : memref<18x64xf32, #tpu.memory_space<vmem>>, vector<16x64xf32>
    %c0_19 = arith.constant 0 : index
    %c1_20 = arith.constant 1 : index
    %c0_21 = arith.constant 0 : index
    %c0_22 = arith.constant 0 : index
    %18 = vector.load %arg3[%c0_19, %c1_20, %c0_21, %c0_22] : memref<4x3x64x64xf32, #tpu.memory_space<vmem>>, vector<1x1x64x64xf32>
    %19 = vector.shape_cast %18 : vector<1x1x64x64xf32> to vector<64x64xf32>
    %cst_23 = arith.constant dense<0.000000e+00> : vector<16x64xf32>
    %20 = tpu.matmul %17, %19, %cst_23 {dimension_numbers = #tpu.dot_dimension_numbers<[1], [0], [0], [1], [0, 0, 1, 1], [], []>} : vector<16x64xf32>, vector<64x64xf32>, vector<16x64xf32> -> vector<16x64xf32>
    %21 = arith.addf %16, %20 : vector<16x64xf32>
    %c2 = arith.constant 2 : index
    %c0_24 = arith.constant 0 : index
    %22 = vector.load %arg8[%c2, %c0_24] : memref<18x64xf32, #tpu.memory_space<vmem>>, vector<16x64xf32>
    %c0_25 = arith.constant 0 : index
    %c2_26 = arith.constant 2 : index
    %c0_27 = arith.constant 0 : index
    %c0_28 = arith.constant 0 : index
    %23 = vector.load %arg3[%c0_25, %c2_26, %c0_27, %c0_28] : memref<4x3x64x64xf32, #tpu.memory_space<vmem>>, vector<1x1x64x64xf32>
    %24 = vector.shape_cast %23 : vector<1x1x64x64xf32> to vector<64x64xf32>
    %cst_29 = arith.constant dense<0.000000e+00> : vector<16x64xf32>
    %25 = tpu.matmul %22, %24, %cst_29 {dimension_numbers = #tpu.dot_dimension_numbers<[1], [0], [0], [1], [0, 0, 1, 1], [], []>} : vector<16x64xf32>, vector<64x64xf32>, vector<16x64xf32> -> vector<16x64xf32>
    %26 = arith.addf %21, %25 : vector<16x64xf32>
    %cst_30 = arith.constant 0.000000e+00 : f32
    %27 = vector.broadcast %cst_30 : f32 to vector<16x64xf32>
    %28 = arith.maximumf %26, %27 : vector<16x64xf32>
    %c1_31 = arith.constant 1 : index
    %c0_32 = arith.constant 0 : index
    %29 = vector.load %arg8[%c1_31, %c0_32] : memref<18x64xf32, #tpu.memory_space<vmem>>, vector<16x64xf32>
    tpu.vector_store %arg8[%c1_31, %c0_32], %28 {strides = array<i32>} : memref<18x64xf32, #tpu.memory_space<vmem>>, vector<16x64xf32>,
    %c0_33 = arith.constant 0 : index
    %c0_34 = arith.constant 0 : index
    %c0_35 = arith.constant 0 : index
    %30 = vector.load %arg1[%c0_33, %c0_34, %c0_35] : memref<1x16x64xf32, #tpu.memory_space<vmem>>, vector<1x16x64xf32>
    %31 = vector.shape_cast %30 : vector<1x16x64xf32> to vector<16x64xf32>
    %cst_36 = arith.constant 0.000000e+00 : f32
    %32 = vector.broadcast %cst_36 : f32 to vector<16x64xf32>
    %c1_37 = arith.constant 1 : index
    %c0_38 = arith.constant 0 : index
    %c0_39 = arith.constant 0 : index
    %33 = vector.load %arg4[%c1_37, %c0_38, %c0_39] : memref<4x1x64xf32, #tpu.memory_space<vmem>>, vector<1x1x64xf32>
    %34 = vector.shape_cast %33 : vector<1x1x64xf32> to vector<1x64xf32>
    %35 = vector.broadcast %34 : vector<1x64xf32> to vector<16x64xf32>
    %36 = arith.addf %32, %35 : vector<16x64xf32>
    %c0_40 = arith.constant 0 : index
    %c0_41 = arith.constant 0 : index
    %37 = vector.load %arg8[%c0_40, %c0_41] : memref<18x64xf32, #tpu.memory_space<vmem>>, vector<16x64xf32>
    %c1_42 = arith.constant 1 : index
    %c0_43 = arith.constant 0 : index
    %c0_44 = arith.constant 0 : index
    %c0_45 = arith.constant 0 : index
    %38 = vector.load %arg3[%c1_42, %c0_43, %c0_44, %c0_45] : memref<4x3x64x64xf32, #tpu.memory_space<vmem>>, vector<1x1x64x64xf32>
    %39 = vector.shape_cast %38 : vector<1x1x64x64xf32> to vector<64x64xf32>
    %cst_46 = arith.constant dense<0.000000e+00> : vector<16x64xf32>
    %40 = tpu.matmul %37, %39, %cst_46 {dimension_numbers = #tpu.dot_dimension_numbers<[1], [0], [0], [1], [0, 0, 1, 1], [], []>} : vector<16x64xf32>, vector<64x64xf32>, vector<16x64xf32> -> vector<16x64xf32>
    %41 = arith.addf %36, %40 : vector<16x64xf32>
    %c1_47 = arith.constant 1 : index
    %c0_48 = arith.constant 0 : index
    %42 = vector.load %arg8[%c1_47, %c0_48] : memref<18x64xf32, #tpu.memory_space<vmem>>, vector<16x64xf32>
    %c1_49 = arith.constant 1 : index
    %c1_50 = arith.constant 1 : index
    %c0_51 = arith.constant 0 : index
    %c0_52 = arith.constant 0 : index
    %43 = vector.load %arg3[%c1_49, %c1_50, %c0_51, %c0_52] : memref<4x3x64x64xf32, #tpu.memory_space<vmem>>, vector<1x1x64x64xf32>
    %44 = vector.shape_cast %43 : vector<1x1x64x64xf32> to vector<64x64xf32>
    %cst_53 = arith.constant dense<0.000000e+00> : vector<16x64xf32>
    %45 = tpu.matmul %42, %44, %cst_53 {dimension_numbers = #tpu.dot_dimension_numbers<[1], [0], [0], [1], [0, 0, 1, 1], [], []>} : vector<16x64xf32>, vector<64x64xf32>, vector<16x64xf32> -> vector<16x64xf32>
    %46 = arith.addf %41, %45 : vector<16x64xf32>
    %c2_54 = arith.constant 2 : index
    %c0_55 = arith.constant 0 : index
    %47 = vector.load %arg8[%c2_54, %c0_55] : memref<18x64xf32, #tpu.memory_space<vmem>>, vector<16x64xf32>
    %c1_56 = arith.constant 1 : index
    %c2_57 = arith.constant 2 : index
    %c0_58 = arith.constant 0 : index
    %c0_59 = arith.constant 0 : index
    %48 = vector.load %arg3[%c1_56, %c2_57, %c0_58, %c0_59] : memref<4x3x64x64xf32, #tpu.memory_space<vmem>>, vector<1x1x64x64xf32>
    %49 = vector.shape_cast %48 : vector<1x1x64x64xf32> to vector<64x64xf32>
    %cst_60 = arith.constant dense<0.000000e+00> : vector<16x64xf32>
    %50 = tpu.matmul %47, %49, %cst_60 {dimension_numbers = #tpu.dot_dimension_numbers<[1], [0], [0], [1], [0, 0, 1, 1], [], []>} : vector<16x64xf32>, vector<64x64xf32>, vector<16x64xf32> -> vector<16x64xf32>
    %51 = arith.addf %46, %50 : vector<16x64xf32>
    %52 = arith.addf %31, %51 : vector<16x64xf32>
    %53 = arith.addf %52, %3 : vector<16x64xf32>
    %cst_61 = arith.constant 0.000000e+00 : f32
    %54 = vector.broadcast %cst_61 : f32 to vector<16x64xf32>
    %55 = arith.maximumf %53, %54 : vector<16x64xf32>
    %c1_62 = arith.constant 1 : index
    %c0_63 = arith.constant 0 : index
    %56 = vector.load %arg8[%c1_62, %c0_63] : memref<18x64xf32, #tpu.memory_space<vmem>>, vector<16x64xf32>
    tpu.vector_store %arg8[%c1_62, %c0_63], %55 {strides = array<i32>} : memref<18x64xf32, #tpu.memory_space<vmem>>, vector<16x64xf32>,
    %cst_64 = arith.constant 0.000000e+00 : f32
    %57 = vector.broadcast %cst_64 : f32 to vector<16x64xf32>
    %c2_65 = arith.constant 2 : index
    %c0_66 = arith.constant 0 : index
    %c0_67 = arith.constant 0 : index
    %58 = vector.load %arg4[%c2_65, %c0_66, %c0_67] : memref<4x1x64xf32, #tpu.memory_space<vmem>>, vector<1x1x64xf32>
    %59 = vector.shape_cast %58 : vector<1x1x64xf32> to vector<1x64xf32>
    %60 = vector.broadcast %59 : vector<1x64xf32> to vector<16x64xf32>
    %61 = arith.addf %57, %60 : vector<16x64xf32>
    %c0_68 = arith.constant 0 : index
    %c0_69 = arith.constant 0 : index
    %62 = vector.load %arg8[%c0_68, %c0_69] : memref<18x64xf32, #tpu.memory_space<vmem>>, vector<16x64xf32>
    %c2_70 = arith.constant 2 : index
    %c0_71 = arith.constant 0 : index
    %c0_72 = arith.constant 0 : index
    %c0_73 = arith.constant 0 : index
    %63 = vector.load %arg3[%c2_70, %c0_71, %c0_72, %c0_73] : memref<4x3x64x64xf32, #tpu.memory_space<vmem>>, vector<1x1x64x64xf32>
    %64 = vector.shape_cast %63 : vector<1x1x64x64xf32> to vector<64x64xf32>
    %cst_74 = arith.constant dense<0.000000e+00> : vector<16x64xf32>
    %65 = tpu.matmul %62, %64, %cst_74 {dimension_numbers = #tpu.dot_dimension_numbers<[1], [0], [0], [1], [0, 0, 1, 1], [], []>} : vector<16x64xf32>, vector<64x64xf32>, vector<16x64xf32> -> vector<16x64xf32>
    %66 = arith.addf %61, %65 : vector<16x64xf32>
    %c1_75 = arith.constant 1 : index
    %c0_76 = arith.constant 0 : index
    %67 = vector.load %arg8[%c1_75, %c0_76] : memref<18x64xf32, #tpu.memory_space<vmem>>, vector<16x64xf32>
    %c2_77 = arith.constant 2 : index
    %c1_78 = arith.constant 1 : index
    %c0_79 = arith.constant 0 : index
    %c0_80 = arith.constant 0 : index
    %68 = vector.load %arg3[%c2_77, %c1_78, %c0_79, %c0_80] : memref<4x3x64x64xf32, #tpu.memory_space<vmem>>, vector<1x1x64x64xf32>
    %69 = vector.shape_cast %68 : vector<1x1x64x64xf32> to vector<64x64xf32>
    %cst_81 = arith.constant dense<0.000000e+00> : vector<16x64xf32>
    %70 = tpu.matmul %67, %69, %cst_81 {dimension_numbers = #tpu.dot_dimension_numbers<[1], [0], [0], [1], [0, 0, 1, 1], [], []>} : vector<16x64xf32>, vector<64x64xf32>, vector<16x64xf32> -> vector<16x64xf32>
    %71 = arith.addf %66, %70 : vector<16x64xf32>
    %c2_82 = arith.constant 2 : index
    %c0_83 = arith.constant 0 : index
    %72 = vector.load %arg8[%c2_82, %c0_83] : memref<18x64xf32, #tpu.memory_space<vmem>>, vector<16x64xf32>
    %c2_84 = arith.constant 2 : index
    %c2_85 = arith.constant 2 : index
    %c0_86 = arith.constant 0 : index
    %c0_87 = arith.constant 0 : index
    %73 = vector.load %arg3[%c2_84, %c2_85, %c0_86, %c0_87] : memref<4x3x64x64xf32, #tpu.memory_space<vmem>>, vector<1x1x64x64xf32>
    %74 = vector.shape_cast %73 : vector<1x1x64x64xf32> to vector<64x64xf32>
    %cst_88 = arith.constant dense<0.000000e+00> : vector<16x64xf32>
    %75 = tpu.matmul %72, %74, %cst_88 {dimension_numbers = #tpu.dot_dimension_numbers<[1], [0], [0], [1], [0, 0, 1, 1], [], []>} : vector<16x64xf32>, vector<64x64xf32>, vector<16x64xf32> -> vector<16x64xf32>
    %76 = arith.addf %71, %75 : vector<16x64xf32>
    %cst_89 = arith.constant 0.000000e+00 : f32
    %77 = vector.broadcast %cst_89 : f32 to vector<16x64xf32>
    %78 = arith.maximumf %76, %77 : vector<16x64xf32>
    %c1_90 = arith.constant 1 : index
    %c0_91 = arith.constant 0 : index
    %79 = vector.load %arg8[%c1_90, %c0_91] : memref<18x64xf32, #tpu.memory_space<vmem>>, vector<16x64xf32>
    tpu.vector_store %arg8[%c1_90, %c0_91], %78 {strides = array<i32>} : memref<18x64xf32, #tpu.memory_space<vmem>>, vector<16x64xf32>,
    %cst_92 = arith.constant 0.000000e+00 : f32
    %80 = vector.broadcast %cst_92 : f32 to vector<16x64xf32>
    %c3 = arith.constant 3 : index
    %c0_93 = arith.constant 0 : index
    %c0_94 = arith.constant 0 : index
    %81 = vector.load %arg4[%c3, %c0_93, %c0_94] : memref<4x1x64xf32, #tpu.memory_space<vmem>>, vector<1x1x64xf32>
    %82 = vector.shape_cast %81 : vector<1x1x64xf32> to vector<1x64xf32>
    %83 = vector.broadcast %82 : vector<1x64xf32> to vector<16x64xf32>
    %84 = arith.addf %80, %83 : vector<16x64xf32>
    %c0_95 = arith.constant 0 : index
    %c0_96 = arith.constant 0 : index
    %85 = vector.load %arg8[%c0_95, %c0_96] : memref<18x64xf32, #tpu.memory_space<vmem>>, vector<16x64xf32>
    %c3_97 = arith.constant 3 : index
    %c0_98 = arith.constant 0 : index
    %c0_99 = arith.constant 0 : index
    %c0_100 = arith.constant 0 : index
    %86 = vector.load %arg3[%c3_97, %c0_98, %c0_99, %c0_100] : memref<4x3x64x64xf32, #tpu.memory_space<vmem>>, vector<1x1x64x64xf32>
    %87 = vector.shape_cast %86 : vector<1x1x64x64xf32> to vector<64x64xf32>
    %cst_101 = arith.constant dense<0.000000e+00> : vector<16x64xf32>
    %88 = tpu.matmul %85, %87, %cst_101 {dimension_numbers = #tpu.dot_dimension_numbers<[1], [0], [0], [1], [0, 0, 1, 1], [], []>} : vector<16x64xf32>, vector<64x64xf32>, vector<16x64xf32> -> vector<16x64xf32>
    %89 = arith.addf %84, %88 : vector<16x64xf32>
    %c1_102 = arith.constant 1 : index
    %c0_103 = arith.constant 0 : index
    %90 = vector.load %arg8[%c1_102, %c0_103] : memref<18x64xf32, #tpu.memory_space<vmem>>, vector<16x64xf32>
    %c3_104 = arith.constant 3 : index
    %c1_105 = arith.constant 1 : index
    %c0_106 = arith.constant 0 : index
    %c0_107 = arith.constant 0 : index
    %91 = vector.load %arg3[%c3_104, %c1_105, %c0_106, %c0_107] : memref<4x3x64x64xf32, #tpu.memory_space<vmem>>, vector<1x1x64x64xf32>
    %92 = vector.shape_cast %91 : vector<1x1x64x64xf32> to vector<64x64xf32>
    %cst_108 = arith.constant dense<0.000000e+00> : vector<16x64xf32>
    %93 = tpu.matmul %90, %92, %cst_108 {dimension_numbers = #tpu.dot_dimension_numbers<[1], [0], [0], [1], [0, 0, 1, 1], [], []>} : vector<16x64xf32>, vector<64x64xf32>, vector<16x64xf32> -> vector<16x64xf32>
    %94 = arith.addf %89, %93 : vector<16x64xf32>
    %c2_109 = arith.constant 2 : index
    %c0_110 = arith.constant 0 : index
    %95 = vector.load %arg8[%c2_109, %c0_110] : memref<18x64xf32, #tpu.memory_space<vmem>>, vector<16x64xf32>
    %c3_111 = arith.constant 3 : index
    %c2_112 = arith.constant 2 : index
    %c0_113 = arith.constant 0 : index
    %c0_114 = arith.constant 0 : index
    %96 = vector.load %arg3[%c3_111, %c2_112, %c0_113, %c0_114] : memref<4x3x64x64xf32, #tpu.memory_space<vmem>>, vector<1x1x64x64xf32>
    %97 = vector.shape_cast %96 : vector<1x1x64x64xf32> to vector<64x64xf32>
    %cst_115 = arith.constant dense<0.000000e+00> : vector<16x64xf32>
    %98 = tpu.matmul %95, %97, %cst_115 {dimension_numbers = #tpu.dot_dimension_numbers<[1], [0], [0], [1], [0, 0, 1, 1], [], []>} : vector<16x64xf32>, vector<64x64xf32>, vector<16x64xf32> -> vector<16x64xf32>
    %99 = arith.addf %94, %98 : vector<16x64xf32>
    %100 = arith.addf %99, %53 : vector<16x64xf32>
    %c0_116 = arith.constant 0 : index
    %c0_117 = arith.constant 0 : index
    %101 = vector.load %arg5[%c0_116, %c0_117] : memref<32x16xf32, #tpu.memory_space<vmem>>, vector<32x16xf32>
    %cst_118 = arith.constant dense<0.000000e+00> : vector<32x64xf32>
    %102 = tpu.matmul %101, %100, %cst_118 {dimension_numbers = #tpu.dot_dimension_numbers<[1], [0], [0], [1], [0, 0, 1, 1], [], []>} : vector<32x16xf32>, vector<16x64xf32>, vector<32x64xf32> -> vector<32x64xf32>
    %c0_119 = arith.constant 0 : index
    %c0_120 = arith.constant 0 : index
    %103 = vector.load %arg6[%c0_119, %c0_120] : memref<64x128xf32, #tpu.memory_space<vmem>>, vector<64x128xf32>
    %cst_121 = arith.constant dense<0.000000e+00> : vector<32x128xf32>
    %104 = tpu.matmul %102, %103, %cst_121 {dimension_numbers = #tpu.dot_dimension_numbers<[1], [0], [0], [1], [0, 0, 1, 1], [], []>} : vector<32x64xf32>, vector<64x128xf32>, vector<32x128xf32> -> vector<32x128xf32>
    %c0_122 = arith.constant 0 : index
    %c0_123 = arith.constant 0 : index
    %c0_124 = arith.constant 0 : index
    %105 = vector.load %arg7[%c0_122, %c0_123, %c0_124] : memref<1x32x128xf32, #tpu.memory_space<vmem>>, vector<1x32x128xf32>
    %106 = vector.shape_cast %105 : vector<1x32x128xf32> to vector<32x128xf32>
    %107 = vector.shape_cast %104 : vector<32x128xf32> to vector<1x32x128xf32>
    tpu.vector_store %arg7[%c0_122, %c0_123, %c0_124], %107 {strides = array<i32>} : memref<1x32x128xf32, #tpu.memory_space<vmem>>, vector<1x32x128xf32>,
    return
  }
  func.func @transform_0(%arg0: i32) -> (i32, i32, i32) {
    %c0_i32 = arith.constant 0 : i32
    %c0_i32_0 = arith.constant 0 : i32
    %c0_i32_1 = arith.constant 0 : i32
    return %arg0, %c0_i32, %c0_i32_0 : i32, i32, i32
  }
  func.func @transform_1(%arg0: i32) -> (i32, i32, i32) {
    %c0_i32 = arith.constant 0 : i32
    %c0_i32_0 = arith.constant 0 : i32
    %c0_i32_1 = arith.constant 0 : i32
    return %arg0, %c0_i32, %c0_i32_0 : i32, i32, i32
  }
  func.func @transform_2(%arg0: i32) -> (i32, i32, i32, i32) {
    %c0_i32 = arith.constant 0 : i32
    %c0_i32_0 = arith.constant 0 : i32
    %c0_i32_1 = arith.constant 0 : i32
    %c0_i32_2 = arith.constant 0 : i32
    %c0_i32_3 = arith.constant 0 : i32
    return %c0_i32, %c0_i32_0, %c0_i32_1, %c0_i32_2 : i32, i32, i32, i32
  }
  func.func @transform_3(%arg0: i32) -> (i32, i32, i32) {
    %c0_i32 = arith.constant 0 : i32
    %c0_i32_0 = arith.constant 0 : i32
    %c0_i32_1 = arith.constant 0 : i32
    %c0_i32_2 = arith.constant 0 : i32
    return %c0_i32, %c0_i32_0, %c0_i32_1 : i32, i32, i32
  }
  func.func @transform_4(%arg0: i32) -> (i32, i32) {
    %c0_i32 = arith.constant 0 : i32
    %c0_i32_0 = arith.constant 0 : i32
    %c0_i32_1 = arith.constant 0 : i32
    return %c0_i32, %c0_i32_0 : i32, i32
  }
  func.func @transform_5(%arg0: i32) -> (i32, i32) {
    %c0_i32 = arith.constant 0 : i32
    %c0_i32_0 = arith.constant 0 : i32
    %c0_i32_1 = arith.constant 0 : i32
    return %c0_i32, %c0_i32_0 : i32, i32
  }
  func.func @transform_6(%arg0: i32) -> (i32, i32, i32) {
    %c0_i32 = arith.constant 0 : i32
    %c0_i32_0 = arith.constant 0 : i32
    %c0_i32_1 = arith.constant 0 : i32
    return %arg0, %c0_i32, %c0_i32_0 : i32, i32, i32
  }
}

</mosaic_0001>

<bundles_post_ra>
// kernel: tile.23
= control target key start
LH: loop header
LB: loop body
LE: loop exit
PB: predicated region body
PF: predicated region fallthrough
CT: control target
= control target key end

     0   :  { %s28_s0 = inlined_call_operand.vmem [shape: f32[4], index: 0, kind: input, shape index: {}]   ;;  %s29_s1 = inlined_call_operand.vmem [shape: f32[16,4], index: 1, kind: output, shape index: {}]  }
   0x1   :  { %v4_v0 = vld [vmem:[%s28_s0] ss:$0 sm:$0xff] }
   0x2   :  { %5 = vst [vmem:[%s29_s1] sm:$0xff] %v4_v0 }
   0x3   :  { %8 = vst [vmem:[%s29_s1 + $0x8] sm:$0xff] %v4_v0 }

// kernel: tile.36
= control target key start
LH: loop header
LB: loop body
LE: loop exit
PB: predicated region body
PF: predicated region fallthrough
CT: control target
= control target key end

     0   :  { %s131_s10 = smov 60   ;;  %s132_s11 = smov 52   ;;  %vm3_vm0 = vcmask 31744   ;;  %vm9_vm1 = vcmask 523744   ;;  %vm15_vm2 = vcmask 490944   ;;  %vm21_vm3 = vcmask 458144   ;;  %s207_s0 = inlined_call_operand.vmem [shape: f32[16,4], index: 0, kind: input, shape index: {}]   ;;  %s208_s1 = inlined_call_operand.vmem [shape: f32[1,1,64], index: 1, kind: output, shape index: {}]  }
   0x1   :  { %v101_v0 = vld [vmem:[%s207_s0 + $0xf] sm:$0x1]   ;;  %v103_v1 = vld [vmem:[%s207_s0 + $0xd] sm:$0x1]   ;;  %v105_v2 = vld [vmem:[%s207_s0 + $0xb] sm:$0x1]  }
   0x2   :  { %7 = vrot.lane.b32.xlu0 %v101_v0, %s131_s10  ;;  %19 = vrot.lane.b32.xlu1 %v103_v1, %s132_s11  ;;  %s133_s14 = smov 44   ;;  %v102_v3 = vld [vmem:[%s207_s0 + $0xe] sm:$0x1]   ;;  %v104_v4 = vld [vmem:[%s207_s0 + $0xc] sm:$0x1]   ;;  %s134_s19 = smov 56  }
   0x3   :  { %31 = vrot.lane.b32.xlu2 %v105_v2, %s133_s14  ;;  %s135_s20 = smov 48   ;;  %v106_v5 = vld [vmem:[%s207_s0 + $0xa] sm:$0x1]   ;;  %s136_s23 = smov 40   ;;  %v107_v6 = vld [vmem:[%s207_s0 + $0x9] sm:$0x1]  }
   0x4   :  { %v108_v7 = vld [vmem:[%s207_s0 + $0x8] sm:$0x1]   ;;  %s137_s28 = smov 36   ;;  %s138_s29 = smov 32   ;;  %v109_v8 = vld [vmem:[%s207_s0 + $0x7] sm:$0x1]  }
   0x5   :  { %s139_s3 = smov 28   ;;  %v110_v9 = vld [vmem:[%s207_s0 + $0x6] sm:$0x1]   ;;  %v111_v10 = vld [vmem:[%s207_s0 + $0x5] sm:$0x1]   ;;  %s140_s8 = smov 24  }
   0x6   :  { %s141_s9 = smov 20   ;;  %v112_v11 = vld [vmem:[%s207_s0 + $0x4] sm:$0x1]   ;;  %s142_s12 = smov 16   ;;  %v113_v12 = vld [vmem:[%s207_s0 + $0x3] sm:$0x1]  }
   0x7   :  { %v114_v13 = vld [vmem:[%s207_s0 + $0x2] sm:$0x1]   ;;  %s143_s17 = smov 12   ;;  %s144_s18 = smov 8   ;;  %v115_v14 = vld [vmem:[%s207_s0 + $0x1] sm:$0x1]  }
   0x8   :  { %s145_s21 = smov 4   ;;  %v2_v15 = vld [vmem:[%s207_s0] sm:$0x1]   ;;  %vm27_vm4 = vcmask 425344   ;;  %vm33_vm5 = vcmask 392544   ;;  %vm39_vm6 = vcmask 359744  }
   0x9   :  { %4 = vst.msk [vmem:[#allocation0] sm:$0x1] %vm3_vm0, %v2_v15   ;;  %vm45_vm7 = vcmask 326944   ;;  %vm51_vm8 = vcmask 294144   ;;  %vm57_vm9 = vcmask 261344   ;;  %vm63_vm10 = vcmask 228544  }
   0xa   :  { %13 = vrot.lane.b32.xlu0 %v102_v3, %s134_s19  ;;  %25 = vrot.lane.b32.xlu1 %v104_v4, %s135_s20  ;;  %vm69_vm11 = vcmask 195744   ;;  %vm75_vm12 = vcmask 162944   ;;  %vm81_vm13 = vcmask 130144   ;;  %vm87_vm14 = vcmask 97344  }
   0xb   :  { %37 = vrot.lane.b32.xlu2 %v106_v5, %s136_s23  ;;  %vm93_vm15 = vcmask 64544  }
  0x12   :  { %43 = vrot.lane.b32.xlu0 %v107_v6, %s137_s28  ;;  %49 = vrot.lane.b32.xlu1 %v108_v7, %s138_s29 }
  0x13   :  { %55 = vrot.lane.b32.xlu2 %v109_v8, %s139_s3 }
  0x1a   :  { %61 = vrot.lane.b32.xlu0 %v110_v9, %s140_s8  ;;  %67 = vrot.lane.b32.xlu1 %v111_v10, %s141_s9 }
  0x1b   :  { %73 = vrot.lane.b32.xlu2 %v112_v11, %s142_s12 }
  0x22   :  { %79 = vrot.lane.b32.xlu0 %v113_v12, %s143_s17  ;;  %85 = vrot.lane.b32.xlu1 %v114_v13, %s144_s18 }
  0x23   :  { %91 = vrot.lane.b32.xlu2 %v115_v14, %s145_s21 }
  0x5d   :  { %v32_v16 = vpop.permute.xlu2 %31  }
  0x65   :  { %v38_v17 = vpop.permute.xlu2 %37  }
  0x6d   :  { %v56_v18 = vpop.permute.xlu2 %55  }
  0x74   :  { %v8_v19 = vpop.permute.xlu0 %7   ;;  %v20_v20 = vpop.permute.xlu1 %19  }
  0x75   :  { %10 = vst.msk [vmem:[#allocation0] sm:$0x1] %vm9_vm1, %v8_v19   ;;  %v74_v21 = vpop.permute.xlu2 %73  }
  0x7c   :  { %v14_v22 = vpop.permute.xlu0 %13   ;;  %v26_v23 = vpop.permute.xlu1 %25  }
  0x7d   :  { %16 = vst.msk [vmem:[#allocation0] sm:$0x1] %vm15_vm2, %v14_v22   ;;  %v92_v24 = vpop.permute.xlu2 %91  }
  0x7e   :  { %22 = vst.msk [vmem:[#allocation0] sm:$0x1] %vm21_vm3, %v20_v20  }
  0x7f   :  { %28 = vst.msk [vmem:[#allocation0] sm:$0x1] %vm27_vm4, %v26_v23  }
  0x80   :  { %34 = vst.msk [vmem:[#allocation0] sm:$0x1] %vm33_vm5, %v32_v16  }
  0x81   :  { %40 = vst.msk [vmem:[#allocation0] sm:$0x1] %vm39_vm6, %v38_v17  }
  0x84   :  { %v44_v25 = vpop.permute.xlu0 %43   ;;  %v50_v26 = vpop.permute.xlu1 %49  }
  0x85   :  { %46 = vst.msk [vmem:[#allocation0] sm:$0x1] %vm45_vm7, %v44_v25  }
  0x86   :  { %52 = vst.msk [vmem:[#allocation0] sm:$0x1] %vm51_vm8, %v50_v26  }
  0x87   :  { %58 = vst.msk [vmem:[#allocation0] sm:$0x1] %vm57_vm9, %v56_v18  }
  0x8c   :  { %v62_v27 = vpop.permute.xlu0 %61   ;;  %v68_v28 = vpop.permute.xlu1 %67  }
  0x8d   :  { %64 = vst.msk [vmem:[#allocation0] sm:$0x1] %vm63_vm10, %v62_v27  }
  0x8e   :  { %70 = vst.msk [vmem:[#allocation0] sm:$0x1] %vm69_vm11, %v68_v28  }
  0x8f   :  { %76 = vst.msk [vmem:[#allocation0] sm:$0x1] %vm75_vm12, %v74_v21  }
  0x94   :  { %v80_v29 = vpop.permute.xlu0 %79   ;;  %v86_v30 = vpop.permute.xlu1 %85  }
  0x95   :  { %82 = vst.msk [vmem:[#allocation0] sm:$0x1] %vm81_vm13, %v80_v29  }
  0x96   :  { %88 = vst.msk [vmem:[#allocation0] sm:$0x1] %vm87_vm14, %v86_v30  }
  0x97   :  { %94 = vst.msk [vmem:[#allocation0] sm:$0x1] %vm93_vm15, %v92_v24  }
  0x9e   :  { %v97_v31 = vld [vmem:[#allocation0] sm:$0x1] }
  0x9f   :  { %100 = vst [vmem:[%s208_s1] sm:$0x1] %v97_v31 }

</bundles_post_ra>
